<compile_context>
chip_gen: v7x
topology: tpu7x:2x2x1
jax: 0.10.0
libtpu: 0.0.40
codegen_flags: <defaults>
</compile_context>

<pallas_src>
import math
import jax
import jax.numpy as jnp
from jax.experimental import pallas as pl
from jax.experimental.pallas import tpu as pltpu


def make_mapping_kernel(num_layers, compute_dtype):
    """Fused MLP kernel body for `num_layers` Linear layers with Tanh between them."""

    def kernel(x_ref, *refs):
        # refs = (w0, b0, w1, b1, ..., w_{L-1}, b_{L-1}, out_ref)
        out_ref = refs[-1]
        params = refs[:-1]

        h = x_ref[...].astype(compute_dtype)                  # [TB, D0]
        for i in range(num_layers):                           # static unroll
            w = params[2 * i][...]                            # [D_i, D_{i+1}], compute_dtype
            b = params[2 * i + 1][...]                        # [1,  D_{i+1}], fp32
            # MXU matmul with fp32 accumulation; bias add + tanh kept in fp32
            # (v5e has no bf16 VPU/EUP path; on v6e/v7x fp32 elementwise is free
            # under MXU latency at these shapes).
            acc = jnp.dot(h, w, preferred_element_type=jnp.float32) + b
            if i < num_layers - 1:
                acc = jnp.tanh(acc)                           # EUP transcendental
                h = acc.astype(compute_dtype)                 # feed next matmul
            else:
                h = acc
        out_ref[...] = h.astype(out_ref.dtype)

    return kernel


def prepare_mapping_params(weights, biases, compute_dtype=jnp.float32):
    """One-time layout prep (do this at parameter-load time, NOT per forward call).

    weights[i]: PyTorch layout [out, in]   -> stored as [in, out] in compute_dtype
    biases[i]:  [out]                      -> stored as [1, out]  in fp32
    """
    params = []
    for w, b in zip(weights, biases):
        w_t = jnp.asarray(w, jnp.float32).T                   # [in, out], lane-dense contraction
        params.append(w_t.astype(compute_dtype))
        params.append(jnp.asarray(b, jnp.float32).reshape(1, -1))
    return tuple(params)


def mapping_forward(x, params, *, compute_dtype=jnp.float32, tile_b=128):
    """Fused Pallas forward for Mappting.

    x:      [B, sizes[0]] float32, B a multiple of 8 (ideally >= 128/256 to fill the MXU)
    params: output of prepare_mapping_params (pre-transposed weights + 2-D biases)
    """
    num_layers = len(params) // 2
    bsz, d0 = x.shape
    out_dim = params[-2].shape[1]

    tb = min(tile_b, bsz)
    assert bsz % tb == 0 and tb % 8 == 0, "batch must tile into multiples of 8"
    grid = (bsz // tb,)

    # x / out stream per grid step; weights & biases map to block (0,0) every step so they
    # stay resident in VMEM across the whole grid.
    in_specs = [pl.BlockSpec((tb, d0), lambda i: (i, 0))]
    for li in range(num_layers):
        w, b = params[2 * li], params[2 * li + 1]
        in_specs.append(pl.BlockSpec(w.shape, lambda i: (0, 0)))
        in_specs.append(pl.BlockSpec(b.shape, lambda i: (0, 0)))
    out_specs = pl.BlockSpec((tb, out_dim), lambda i: (i, 0))

    # Advisory cost estimate for XLA's scheduler.
    layer_dims = [params[2 * li].shape for li in range(num_layers)]   # [(in, out), ...]
    flops = sum(2 * bsz * di * do for di, do in layer_dims)
    transcendentals = sum(bsz * do for _, do in layer_dims[:-1])
    param_bytes = sum(int(p.size) * p.dtype.itemsize for p in params)
    bytes_accessed = int(x.size) * x.dtype.itemsize + param_bytes + bsz * out_dim * 4

    # VMEM budget: double-buffered x/out tiles + resident params + intermediates, headroom.
    max_dim = max([d0] + [do for _, do in layer_dims])
    tile_io_bytes = tb * d0 * 4 + tb * out_dim * 4
    act_bytes = tb * max_dim * 4
    vmem_limit = max(16 << 20,
                     min(128 << 20,
                         2 * (param_bytes + tile_io_bytes) + 8 * act_bytes + (1 << 20)))

    return pl.pallas_call(
        make_mapping_kernel(num_layers, compute_dtype),
        out_shape=jax.ShapeDtypeStruct((bsz, out_dim), jnp.float32),
        grid=grid,
        in_specs=in_specs,
        out_specs=out_specs,
        compiler_params=pltpu.CompilerParams(
            dimension_semantics=("parallel",),        # megacore sharding on v7x
            vmem_limit_bytes=int(vmem_limit)),
        cost_estimate=pl.CostEstimate(flops=int(flops),
                                      transcendentals=int(transcendentals),
                                      bytes_accessed=int(bytes_accessed)),
    )(x, *params)


def mapping_ref(x, weights, biases):
    """Pure-JAX fp32 reference replicating the PyTorch forward."""
    h = x
    n = len(weights)
    for i, (w, b) in enumerate(zip(weights, biases)):
        h = h @ w.T + b
        if i < n - 1:
            h = jnp.tanh(h)
    return h


if __name__ == "__main__":
    # Lane/sublane-friendly shapes consistent with the module: sizes=(128, 256, 128).
    # Batch 256 (multiple of 8, two 128-row tiles) so the MXU M dimension is actually
    # filled and the batch grid / megacore path is exercised.
    sizes = (128, 256, 128)
    BATCH = 256
    num_layers = len(sizes) - 1

    key = jax.random.PRNGKey(0)
    keys = jax.random.split(key, 1 + 2 * num_layers)

    x = jax.random.normal(keys[0], (BATCH, sizes[0]), dtype=jnp.float32)

    weights, biases = [], []
    for i in range(num_layers):
        fan_in = sizes[i]
        scale = 1.0 / math.sqrt(fan_in)
        # PyTorch layout: weight [out, in], bias [out]
        w = scale * jax.random.normal(keys[1 + 2 * i], (sizes[i + 1], sizes[i]),
                                      dtype=jnp.float32)
        b = scale * jax.random.normal(keys[2 + 2 * i], (sizes[i + 1],),
                                      dtype=jnp.float32)
        weights.append(w)
        biases.append(b)

    ref = mapping_ref(x, weights, biases)

    # fp32 MXU operands (exact path): strict tolerance vs fp32 reference.
    params_f32 = prepare_mapping_params(weights, biases, compute_dtype=jnp.float32)
    out_f32 = jax.block_until_ready(mapping_forward(x, params_f32,
                                                    compute_dtype=jnp.float32))
    assert out_f32.shape == (BATCH, sizes[-1])
    assert jnp.allclose(out_f32, ref, atol=1e-5, rtol=1e-5), "fp32 kernel mismatch vs reference"

    # bf16 MXU operands + fp32 accumulation (v6e/v7x fast path): relaxed tolerance.
    params_bf16 = prepare_mapping_params(weights, biases, compute_dtype=jnp.bfloat16)
    out_bf16 = jax.block_until_ready(mapping_forward(x, params_bf16,
                                                     compute_dtype=jnp.bfloat16))
    assert out_bf16.shape == (BATCH, sizes[-1])
    assert jnp.allclose(out_bf16, ref, atol=5e-2, rtol=5e-2), "bf16 kernel mismatch vs reference"

    print("KERNEL_OK")
</pallas_src>

<mosaic_0001>
module attributes {stable_mosaic.version = 11 : i64} {
  func.func @kernel(%arg0: i32, %arg1: memref<128x128xf32, #tpu.memory_space<vmem>>, %arg2: memref<128x256xf32, #tpu.memory_space<vmem>>, %arg3: memref<1x256xf32, #tpu.memory_space<vmem>>, %arg4: memref<256x128xf32, #tpu.memory_space<vmem>>, %arg5: memref<1x128xf32, #tpu.memory_space<vmem>>, %arg6: memref<128x128xf32, #tpu.memory_space<vmem>>) attributes {dimension_semantics = [#tpu.dimension_semantics<parallel>], iteration_bounds = array<i64: 2>, scalar_prefetch = 0 : i64, scratch_operands = 0 : i64, tpu.core_type = #tpu.core_type<tc>, window_params = [{transform_indices = @transform_0, window_bounds = array<i64: 128, 128>}, {pipeline_mode = #tpu.pipeline_mode<synchronous>, transform_indices = @transform_1, window_bounds = array<i64: 128, 256>}, {pipeline_mode = #tpu.pipeline_mode<synchronous>, transform_indices = @transform_2, window_bounds = array<i64: 1, 256>}, {pipeline_mode = #tpu.pipeline_mode<synchronous>, transform_indices = @transform_3, window_bounds = array<i64: 256, 128>}, {pipeline_mode = #tpu.pipeline_mode<synchronous>, transform_indices = @transform_4, window_bounds = array<i64: 1, 128>}, {transform_indices = @transform_5, window_bounds = array<i64: 128, 128>}]} {
    %c0 = arith.constant 0 : index
    %c0_0 = arith.constant 0 : index
    %0 = vector.load %arg1[%c0, %c0_0] : memref<128x128xf32, #tpu.memory_space<vmem>>, vector<128x128xf32>
    %c0_1 = arith.constant 0 : index
    %c0_2 = arith.constant 0 : index
    %1 = vector.load %arg2[%c0_1, %c0_2] : memref<128x256xf32, #tpu.memory_space<vmem>>, vector<128x256xf32>
    %c0_3 = arith.constant 0 : index
    %c0_4 = arith.constant 0 : index
    %2 = vector.load %arg3[%c0_3, %c0_4] : memref<1x256xf32, #tpu.memory_space<vmem>>, vector<1x256xf32>
    %cst = arith.constant dense<0.000000e+00> : vector<128x256xf32>
    %3 = tpu.matmul %0, %1, %cst {dimension_numbers = #tpu.dot_dimension_numbers<[1], [0], [0], [1], [0, 0, 1, 1], [], []>} : vector<128x128xf32>, vector<128x256xf32>, vector<128x256xf32> -> vector<128x256xf32>
    %4 = vector.broadcast %2 : vector<1x256xf32> to vector<128x256xf32>
    %5 = arith.addf %3, %4 : vector<128x256xf32>
    %6 = math.tanh %5 : vector<128x256xf32>
    %c0_5 = arith.constant 0 : index
    %c0_6 = arith.constant 0 : index
    %7 = vector.load %arg4[%c0_5, %c0_6] : memref<256x128xf32, #tpu.memory_space<vmem>>, vector<256x128xf32>
    %c0_7 = arith.constant 0 : index
    %c0_8 = arith.constant 0 : index
    %8 = vector.load %arg5[%c0_7, %c0_8] : memref<1x128xf32, #tpu.memory_space<vmem>>, vector<1x128xf32>
    %cst_9 = arith.constant dense<0.000000e+00> : vector<128x128xf32>
    %9 = tpu.matmul %6, %7, %cst_9 {dimension_numbers = #tpu.dot_dimension_numbers<[1], [0], [0], [1], [0, 0, 1, 1], [], []>} : vector<128x256xf32>, vector<256x128xf32>, vector<128x128xf32> -> vector<128x128xf32>
    %10 = vector.broadcast %8 : vector<1x128xf32> to vector<128x128xf32>
    %11 = arith.addf %9, %10 : vector<128x128xf32>
    %c0_10 = arith.constant 0 : index
    %c0_11 = arith.constant 0 : index
    %12 = vector.load %arg6[%c0_10, %c0_11] : memref<128x128xf32, #tpu.memory_space<vmem>>, vector<128x128xf32>
    tpu.vector_store %arg6[%c0_10, %c0_11], %11 {strides = array<i32>} : memref<128x128xf32, #tpu.memory_space<vmem>>, vector<128x128xf32>,
    return
  }
  func.func @transform_0(%arg0: i32) -> (i32, i32) {
    %c0_i32 = arith.constant 0 : i32
    %c0_i32_0 = arith.constant 0 : i32
    return %arg0, %c0_i32 : i32, i32
  }
  func.func @transform_1(%arg0: i32) -> (i32, i32) {
    %c0_i32 = arith.constant 0 : i32
    %c0_i32_0 = arith.constant 0 : i32
    %c0_i32_1 = arith.constant 0 : i32
    return %c0_i32, %c0_i32_0 : i32, i32
  }
  func.func @transform_2(%arg0: i32) -> (i32, i32) {
    %c0_i32 = arith.constant 0 : i32
    %c0_i32_0 = arith.constant 0 : i32
    %c0_i32_1 = arith.constant 0 : i32
    return %c0_i32, %c0_i32_0 : i32, i32
  }
  func.func @transform_3(%arg0: i32) -> (i32, i32) {
    %c0_i32 = arith.constant 0 : i32
    %c0_i32_0 = arith.constant 0 : i32
    %c0_i32_1 = arith.constant 0 : i32
    return %c0_i32, %c0_i32_0 : i32, i32
  }
  func.func @transform_4(%arg0: i32) -> (i32, i32) {
    %c0_i32 = arith.constant 0 : i32
    %c0_i32_0 = arith.constant 0 : i32
    %c0_i32_1 = arith.constant 0 : i32
    return %c0_i32, %c0_i32_0 : i32, i32
  }
  func.func @transform_5(%arg0: i32) -> (i32, i32) {
    %c0_i32 = arith.constant 0 : i32
    %c0_i32_0 = arith.constant 0 : i32
    return %arg0, %c0_i32 : i32, i32
  }
}

</mosaic_0001>

<bundles_post_ra>
// kernel: tpu_custom_call.1
= control target key start
LH: loop header
LB: loop body
LE: loop exit
PB: predicated region body
PF: predicated region fallthrough
CT: control target
= control target key end

     0   :  { %10 = vsyncpa [#allocation3], 0  ;;  %s1692_s0 = inlined_call_operand.hbm [shape: f32[256,128], index: 0, kind: input, shape index: {}]   ;;  %s1693_s1 = inlined_call_operand.hbm [shape: f32[128,256], index: 1, kind: input, shape index: {}]   ;;  %s1694_s2 = inlined_call_operand.vmem [shape: f32[1,256], index: 2, kind: input, shape index: {}]   ;;  %s1695_s3 = inlined_call_operand.hbm [shape: f32[256,128], index: 3, kind: input, shape index: {}]   ;;  %s1696_s4 = inlined_call_operand.vmem [shape: f32[1,128], index: 4, kind: input, shape index: {}]   ;;  %s1697_s5 = inlined_call_operand.hbm [shape: f32[256,128], index: 5, kind: output, shape index: {}]  }
   0x1   :  { %12 = vsyncpa [#allocation3 + $0x1], 0 }
   0x2   :  { %13 = vsyncpa [#allocation6], 0 }
   0x3   :  { %14 = vsyncpa [#allocation4], 0 }
   0x4   :  { %16 = vsyncpa [#allocation4 + $0x1], 0  ;;  %s1335_s18 = smov 0   ;;  %s1337_s19 = smov 0  }
   0x5   :  { %s1339_s20 = smov 0   ;;  %s1341_s21 = smov 0  }
   0x6 LB: > { %s1356_s22 = sadd.s32 4294967295, %s1292_s21   ;;  %s833_s23 = sadd.s32 4294967294, %s1292_s21   ;;  %s1292_s21 = sphi %s1341_s21, %s1717_s21   ;;  %s1288_s20 = sphi %s1339_s20, %s1716_s20   ;;  %s1284_s19 = sphi %s1337_s19, %s1715_s19   ;;  %s1280_s18 = sphi %s1335_s18, %s1714_s18  }
   0x7   : > { %p42_p0 = scmp.ne.s32.totalorder %s1284_s19, %s1280_s18  ;;  %p1698_p1 = scmp.eq.s32.totalorder %s1356_s22, 0 }
   0x8   : > { %p156_p3 = scmp.eq.s32.totalorder %s833_s23, 1  ;;  %p834_p5 = scmp.ge.s32.totalorder %s1292_s21, 1 }
   0x9   : > { %p1365_p4 = por %p1698_p1, %p42_p0  ;;  %p163_p7 = scmp.lt.s32.totalorder %s1292_s21, 3 }
   0xa   : > { %p1370_p6 = por %p156_p3, %p42_p0  ;;  %s1294_s27 = smov [#allocation5]  }
   0xb   : > { %s1701_s24 = scalar_select %p1365_p4, 1, 0 }
   0xc   : > { %s1702_s25 = scalar_select %p1370_p6, 1, 0 }
   0xd   : > { %p1375_p8 = pnand %p834_p5, %p163_p7  ;;  %s175_s28 = sshll.u32 %s1294_s27, 4  ;;  %s1379_s28 = int_to_ptr.vmem [resolvable:$true] %s175_s28 }
   0xe   : > { %s1295_s30 = smov [#allocation7]   ;;  %s1136_s9 = scalar_lea.hbm %s1693_s1, 4096 }
   0xf   : > { %p1010_p9 = pneg %p1375_p8  ;;  %s191_s6 = sshll.u32 %s1295_s30, 4  ;;  %s1390_s6 = int_to_ptr.vmem [resolvable:$true] %s191_s6 }
  0x10   : > { %p1137_p12 = scmp.ne.s32.totalorder %s1693_s1, %s1136_s9  ;;  %p1143_p5 = scmp.lt.u32.totalorder %s1136_s9, %s1693_s1 }
  0x11   : > { %p1386_p11 = pnand %p1010_p9, %p1698_p1 }
  0x13   : > { %p1138_p13 = pneg %p1386_p11 }
  0x15   : > { %p1139_p0 = pnand %p1138_p13, %p1137_p12 }
  0x17   : > { %p1140_p3 = pneg %p1139_p0 }
  0x19   : > { %p1145_p7 = pnand %p1143_p5, %p1140_p3 }
  0x1b   : > { %1148 = shalt.err (!%p1145_p7)
}
  0x1c   : > { %s1149_s14 = scalar_lea.vmem %s1379_s28, 4096  ;;  %p1157_p2 = scmp.lt.s32.totalorder %s1379_s28, %s1379_s28 }
  0x1d   : > { %p1150_p9 = scmp.ne.s32.totalorder %s1379_s28, %s1149_s14  ;;  %p1158_p12 = scmp.lt.s32.totalorder %s1149_s14, %s1149_s14 }
  0x1f   : > { %p1152_p10 = pnand %p1150_p9, %p1138_p13  ;;  %p1159_p0 = por %p1158_p12, %p1157_p2 }
  0x21   : > { %p1153_p1 = pneg %p1152_p10 }
  0x23   : > { %p1160_p6 = pnand %p1159_p0, %p1153_p1 }
  0x25   : > { %1163 = shalt.err (!%p1160_p6)
}
  0x26   : > { %s1296_s15 = smov 256   ;;  %s1297_s16 = smov 16  }
  0x27   : > { %1013 = dma.hbm_to_vmem [thread:$0]  (!%p1386_p11), %s1693_s1, 4096, %s1379_s28, [#allocation6], %s1296_s15, %s1296_s15, %s1297_s16  }
  0x28   : > { %s1164_s7 = scalar_lea.hbm %s1695_s3, 4096 }
  0x29   : > { %p1165_p2 = scmp.ne.s32.totalorder %s1695_s3, %s1164_s7  ;;  %p1171_p10 = scmp.lt.u32.totalorder %s1164_s7, %s1695_s3 }
  0x2b   : > { %p1167_p1 = pnand %p1165_p2, %p1138_p13 }
  0x2d   : > { %p1168_p6 = pneg %p1167_p1 }
  0x2f   : > { %p1173_p3 = pnand %p1171_p10, %p1168_p6 }
  0x31   : > { %1176 = shalt.err (!%p1173_p3)
}
  0x32   : > { %s1177_s28 = scalar_lea.vmem %s1390_s6, 4096  ;;  %p1185_p12 = scmp.lt.s32.totalorder %s1390_s6, %s1390_s6 }
  0x33   : > { %p1178_p5 = scmp.ne.s32.totalorder %s1390_s6, %s1177_s28  ;;  %p1186_p0 = scmp.lt.s32.totalorder %s1177_s28, %s1177_s28 }
  0x35   : > { %p1180_p7 = pnand %p1178_p5, %p1138_p13  ;;  %p1187_p2 = por %p1186_p0, %p1185_p12 }
  0x37   : > { %p1181_p9 = pneg %p1180_p7 }
  0x39   : > { %p1188_p1 = pnand %p1187_p2, %p1181_p9 }
  0x3b   : > { %1191 = shalt.err (!%p1188_p1)
}
  0x3c   : > { %s1298_s12 = smov 128   ;;  %s1299_s13 = smov 8  }
  0x3d   : > { %1016 = dma.hbm_to_vmem [thread:$0]  (!%p1386_p11), %s1695_s3, 4096, %s1390_s6, [#allocation6], %s1298_s12, %s1298_s12, %s1299_s13  }
  0x3e   : > { %s1448_s16 = sadd.s32 1, %s1292_s21   ;;  %s29_s23 = sadd.s32 1, %s1288_s20 }
  0x3f   : > { %s26_s17 = ssub.s32 %s1292_s21, %s1448_s16  ;;  %p36_p6 = scmp.ne.s32.totalorder %s1288_s20, %s1284_s19 }
  0x40   : > { %p27_p13 = scmp.eq.s32.totalorder %s26_s17, 0  ;;  %p37_p10 = scmp.eq.s32.totalorder %s1292_s21, 0 }
  0x41   : > { %p1705_p5 = scmp.eq.s32.totalorder %s1356_s22, 1  ;;  %p1027_p9 = scmp.lt.s32.totalorder %s1292_s21, 2 }
  0x42   : > { %s1457_s27 = scalar_select %p27_p13, %s1288_s20, %s29_s23  }
  0x43   : > { %p38_p3 = por %p37_p10, %p36_p6  ;;  %p1461_p7 = por %p1705_p5, %p36_p6 }
  0x44   : > { %s208_s30 = sand.u32 1, %s1288_s20   ;;  %s852_s6 = sshll.u32 %s1292_s21, 11 }
  0x45   : > { %s1706_s29 = scalar_select %p1461_p7, 1, 0 }
  0x46   : > { %s838_s7 = sshll.u32 %s208_s30, 7  ;;  %s1471_s10 = scalar_lea.hbm %s1692_s0, %s852_s6 }
  0x47   : > { %s212_s11 = scalar_lea.vmem [#allocation2], %s838_s7  ;;  %p1475_p11 = pnand %p1027_p9, %p38_p3 }
  0x48   : > { %s219_s28 = sshll.u32 %s212_s11, 4  ;;  %s1479_s15 = scalar_lea.sflag [#allocation3], %s208_s30  ;;  %s1473_s28 = int_to_ptr.vmem [resolvable:$true] %s219_s28 }
  0x49   : > { %s1192_s17 = scalar_lea.hbm %s1471_s10, 2048  ;;  %p1194_p0 = pneg %p1475_p11 }
  0x4a   : > { %p1193_p12 = scmp.ne.s32.totalorder %s1471_s10, %s1192_s17  ;;  %s1197_s6 = scalar_lea.hbm %s1692_s0, 4096 }
  0x4b   : > { %p1198_p13 = scmp.lt.u32.totalorder %s1471_s10, %s1692_s0  ;;  %p1199_p6 = scmp.lt.u32.totalorder %s1197_s6, %s1192_s17 }
  0x4c   : > { %p1195_p2 = pnand %p1194_p0, %p1193_p12  ;;  %p1201_p3 = scmp.lt.u32.totalorder %s1192_s17, %s1471_s10 }
  0x4d   : > { %p1200_p10 = por %p1199_p6, %p1198_p13 }
  0x4e   : > { %p1196_p1 = pneg %p1195_p2 }
  0x4f   : > { %p1202_p5 = por %p1201_p3, %p1200_p10 }
  0x51   : > { %p1203_p9 = pnand %p1202_p5, %p1196_p1 }
  0x53   : > { %1206 = shalt.err (!%p1203_p9)
}
  0x54   : > { %s1207_s30 = scalar_lea.vmem %s1473_s28, 2048  ;;  %s1300_s11 = smov [#allocation2]  }
  0x55   : > { %p1208_p12 = scmp.ne.s32.totalorder %s1473_s28, %s1207_s30  ;;  %s1212_s23 = sshll.u32 %s1300_s11, 4  ;;  %s1213_s23 = int_to_ptr.vmem [resolvable:$false] %s1212_s23 }
  0x56   : > { %s1214_s7 = scalar_lea.vmem %s1213_s23, 4096  ;;  %p1215_p4 = scmp.lt.s32.totalorder %s1473_s28, %s1213_s23 }
  0x57   : > { %p1210_p2 = pnand %p1208_p12, %p1194_p0  ;;  %p1216_p13 = scmp.lt.s32.totalorder %s1214_s7, %s1207_s30 }
  0x59   : > { %p1211_p7 = pneg %p1210_p2  ;;  %p1217_p6 = por %p1216_p13, %p1215_p4 }
  0x5b   : > { %p1218_p10 = pnand %p1217_p6, %p1211_p7 }
  0x5d   : > { %1221 = shalt.err (!%p1218_p10)
}
  0x5e   : > { %1020 = dma.hbm_to_vmem [thread:$0]  (!%p1475_p11), %s1471_s10, 2048, %s1473_s28, %s1479_s15, %s1298_s12, %s1298_s12, %s1299_s13  }
  0x5f   : > { %231 = sbr.rel (%p1375_p8) target bundleno = 660 (0x294), region = 40  ;;  %s1513_s17 = sand.u32 (!%p1375_p8), 1, %s1284_s19  }
  0x60   : > { %s842_s6 = sshll.u32 (!%p1375_p8), %s1513_s17, 7  ;;  %s234_s8 = scalar_lea.sflag (!%p1375_p8), [#allocation3], %s1513_s17 }
  0x61   : > { %s1519_s14 = scalar_lea.vmem (!%p1375_p8), [#allocation2], %s842_s6  ;;  %p1708_p4 = scmp.ne.s32.totalorder (!%p1375_p8), %s1701_s24, 0 }
  0x66   : > { %1267 = dma.done.wait (%p1708_p4), %s234_s8, 2048  }
  0x67   : > { %1269 = vsyncadd (%p1708_p4), %s234_s8, 4294965248  ;;  %p1709_p7 = scmp.eq.s32.totalorder %s1356_s22, 0 }
  0x69   : > { %1271 = dma.done.wait (%p1709_p7), [#allocation6], 8192   ;;  %p1710_p8 = pmov %p1709_p7 }
  0x6a   : > { %v1301_v0 = vmov 0.0   ;;  %v291_v1 = vld [vmem:[#allocation5 + $0x8] sm:$0xff]  ;;  %v293_v2 = vld [vmem:[#allocation5 + $0x18] sm:$0xff]  ;;  %v290_v3 = vld [vmem:[#allocation5] sm:$0xff]  ;;  %s1608_s10 = scalar_lea.vmem [#allocation8], %s842_s6  ;;  %s853_s28 = sshll.u32 %s1356_s22, 11 }
  0x6b   : > { %1273 = vsyncadd (%p1710_p8), [#allocation6], 4294959104  ;;  %398 = vmatprep.mubr.f32.mxu0 %v1301_v0  ;;  %v934_v4 = vpack.c.bf16 %v293_v2, %v291_v1  ;;  %v292_v5 = vld [vmem:[#allocation5 + $0x10] sm:$0xff]  ;;  %v295_v6 = vld [vmem:[#allocation5 + $0x28] sm:$0xff]  ;;  %s741_s15 = sshll.u32 %s1608_s10, 4  ;;  %s1644_s11 = scalar_lea.hbm %s1697_s5, %s853_s28  ;;  %s1646_s15 = int_to_ptr.vmem [resolvable:$true] %s741_s15 }
  0x6c   : > { %v297_v7 = vld [vmem:[#allocation5 + $0x38] sm:$0xff]  ;;  %v936_v8 = vpack.c.bf16 %v292_v5, %v290_v3  ;;  %v294_v10 = vld [vmem:[#allocation5 + $0x20] sm:$0xff]  ;;  %v296_v11 = vld [vmem:[#allocation5 + $0x30] sm:$0xff]  ;;  %s728_s23 = scalar_lea.sflag [#allocation4], %s1513_s17  ;;  %s1222_s7 = scalar_lea.vmem %s1646_s15, 2048 }
  0x6d   : > { %v938_v9 = vpack.c.bf16 %v297_v7, %v295_v6  ;;  %v299_v12 = vld [vmem:[#allocation5 + $0x48] sm:$0xff]  ;;  %935 = vmatprep.subr.bf16.mxu0 %v934_v4  ;;  %v301_v13 = vld [vmem:[#allocation5 + $0x58] sm:$0xff]  ;;  %v940_v14 = vpack.c.bf16 %v296_v11, %v294_v10  ;;  %v298_v16 = vld [vmem:[#allocation5 + $0x40] sm:$0xff]  ;;  %p1223_p11 = scmp.ne.s32.totalorder %s1646_s15, %s1222_s7  ;;  %p1711_p0 = scmp.ne.s32.totalorder %s1706_s29, 0 }
  0x6e   : > { %937 = vmatpush1.bf16.msra.mxu0 %v936_v8  ;;  %v942_v15 = vpack.c.bf16 %v301_v13, %v299_v12  ;;  %v300_v17 = vld [vmem:[#allocation5 + $0x50] sm:$0xff]  ;;  %v303_v18 = vld [vmem:[#allocation5 + $0x68] sm:$0xff]  ;;  %v305_v19 = vld [vmem:[#allocation5 + $0x78] sm:$0xff]  ;;  %s1302_s22 = smov [#allocation8]  }
  0x6f   : > { %939 = vmatprep.subr.bf16.mxu0 %v938_v9  ;;  %v944_v20 = vpack.c.bf16 %v300_v17, %v298_v16  ;;  %v946_v21 = vpack.c.bf16 %v305_v19, %v303_v18  ;;  %v302_v22 = vld [vmem:[#allocation5 + $0x60] sm:$0xff]  ;;  %v304_v23 = vld [vmem:[#allocation5 + $0x70] sm:$0xff]  ;;  %v307_v24 = vld [vmem:[#allocation5 + $0x88] sm:$0xff]  ;;  %p1224_p1 = pnand %p1223_p11, %p1711_p0  ;;  %s1226_s6 = sshll.u32 %s1302_s22, 4  ;;  %s1227_s6 = int_to_ptr.vmem [resolvable:$false] %s1226_s6 }
  0x70   : > { %v309_v25 = vld [vmem:[#allocation5 + $0x98] sm:$0xff]  ;;  %v948_v26 = vpack.c.bf16 %v304_v23, %v302_v22  ;;  %v306_v28 = vld [vmem:[#allocation5 + $0x80] sm:$0xff]  ;;  %v308_v29 = vld [vmem:[#allocation5 + $0x90] sm:$0xff]  ;;  %s1228_s8 = scalar_lea.vmem %s1227_s6, 4096  ;;  %p1229_p5 = scmp.lt.s32.totalorder %s1646_s15, %s1227_s6 }
  0x71   : > { %v950_v27 = vpack.c.bf16 %v309_v25, %v307_v24  ;;  %v311_v30 = vld [vmem:[#allocation5 + $0xa8] sm:$0xff]  ;;  %v313_v31 = vld [vmem:[#allocation5 + $0xb8] sm:$0xff]  ;;  %v310_v32 = vld [vmem:[#allocation5 + $0xa0] sm:$0xff]  ;;  %v952_v34 = vpack.c.bf16 %v308_v29, %v306_v28  ;;  %p1225_p3 = pneg %p1224_p1  ;;  %p1230_p9 = scmp.lt.s32.totalorder %s1228_s8, %s1222_s7 }
  0x72   : > { %941 = vmatpush1.bf16.msra.mxu0 %v940_v14  ;;  %v312_v33 = vld [vmem:[#allocation5 + $0xb0] sm:$0xff]  ;;  %v315_v35 = vld [vmem:[#allocation5 + $0xc8] sm:$0xff]  ;;  %v317_v36 = vld [vmem:[#allocation5 + $0xd8] sm:$0xff]  ;;  %v954_v40 = vpack.c.bf16 %v313_v31, %v311_v30 }
  0x73   : > { %943 = vmatprep.subr.bf16.mxu0 %v942_v15  ;;  %v543_v37 = vld [vmem:[#allocation7 + $0x80] sm:$0xff]  ;;  %v544_v38 = vld [vmem:[#allocation7 + $0x88] sm:$0xff]  ;;  %v545_v43 = vld [vmem:[#allocation7 + $0x90] sm:$0xff]  ;;  %v956_v51 = vpack.c.bf16 %v312_v33, %v310_v32  ;;  %v958_v55 = vpack.c.bf16 %v317_v36, %v315_v35  ;;  %p1231_p12 = por %p1230_p9, %p1229_p5 }
  0x74   : > { %v527_v39 = vld [vmem:[#allocation7] sm:$0xff]  ;;  %v966_v41 = vpack.c.bf16 %v544_v38, %v543_v37  ;;  %v528_v42 = vld [vmem:[#allocation7 + $0x8] sm:$0xff]  ;;  %v546_v44 = vld [vmem:[#allocation7 + $0x98] sm:$0xff] }
  0x75   : > { %v968_v45 = vpack.c.bf16 %v528_v42, %v527_v39  ;;  %v970_v46 = vpack.c.bf16 %v546_v44, %v545_v43  ;;  %v529_v47 = vld [vmem:[#allocation7 + $0x10] sm:$0xff]  ;;  %v530_v48 = vld [vmem:[#allocation7 + $0x18] sm:$0xff]  ;;  %v547_v49 = vld [vmem:[#allocation7 + $0xa0] sm:$0xff]  ;;  %p1232_p2 = pnand %p1231_p12, %p1225_p3 }
  0x76   : > { %945 = vmatpush1.bf16.msra.mxu0 %v944_v20  ;;  %967 = vmatprep.subr.bf16.mxu1 %v966_v41  ;;  %v548_v50 = vld [vmem:[#allocation7 + $0xa8] sm:$0xff]  ;;  %v314_v52 = vld [vmem:[#allocation5 + $0xc0] sm:$0xff]  ;;  %v316_v53 = vld [vmem:[#allocation5 + $0xd0] sm:$0xff]  ;;  %v972_v54 = vpack.c.bf16 %v530_v48, %v529_v47 }
  0x77   : > { %947 = vmatprep.subr.bf16.mxu0 %v946_v21  ;;  %969 = vmatpush3.bf16.msra.mxu1 %v968_v45  ;;  %v319_v56 = vld [vmem:[#allocation5 + $0xe8] sm:$0xff]  ;;  %v974_v57 = vpack.c.bf16 %v548_v50, %v547_v49  ;;  %v531_v58 = vld [vmem:[#allocation7 + $0x20] sm:$0xff]  ;;  %v321_v60 = vld [vmem:[#allocation5 + $0xf8] sm:$0xff]  ;;  %v960_v63 = vpack.c.bf16 %v316_v53, %v314_v52  ;;  %v324_v49 = vlaneseq }
  0x78   : > { %971 = vmatprep.subr.bf16.mxu1 %v970_v46  ;;  %v532_v59 = vld [vmem:[#allocation7 + $0x28] sm:$0xff]  ;;  %v549_v61 = vld [vmem:[#allocation7 + $0xb0] sm:$0xff]  ;;  %v550_v62 = vld [vmem:[#allocation7 + $0xb8] sm:$0xff]  ;;  %v962_v3 = vpack.c.bf16 %v321_v60, %v319_v56 }
  0x79   : > { %v318_v1 = vld [vmem:[#allocation5 + $0xe0] sm:$0xff]  ;;  %v976_v2 = vpack.c.bf16 %v532_v59, %v531_v58  ;;  %v320_v4 = vld [vmem:[#allocation5 + $0xf0] sm:$0xff]  ;;  %v978_v5 = vpack.c.bf16 %v550_v62, %v549_v61  ;;  %v534_v7 = vld [vmem:[#allocation7 + $0x38] sm:$0xff]  ;;  %v325_v50 = vshrl.u32 %v324_v49, 7 }
  0x7a   : > { %949 = vmatpush1.bf16.msra.mxu0 %v948_v26  ;;  %v533_v6 = vld [vmem:[#allocation7 + $0x30] sm:$0xff]  ;;  %v964_v8 = vpack.c.bf16 %v320_v4, %v318_v1  ;;  %v274_v10 = vld [vmem:[%s1519_s14] sm:$0xff]  ;;  %v275_v11 = vld [vmem:[%s1519_s14 + $0x8] sm:$0xff] }
  0x7b   : > { %951 = vmatprep.subr.bf16.mxu0 %v950_v27  ;;  %973 = vmatpush3.bf16.msra.mxu1 %v972_v54  ;;  %v980_v9 = vpack.c.bf16 %v534_v7, %v533_v6  ;;  %v276_v12 = vld [vmem:[%s1519_s14 + $0x10] sm:$0xff]  ;;  %v277_v13 = vld [vmem:[%s1519_s14 + $0x18] sm:$0xff]  ;;  %v278_v14 = vld [vmem:[%s1519_s14 + $0x20] sm:$0xff]  ;;  %v330_v53 = vsub.s32 1, %v325_v50 }
  0x7c   : > { %975 = vmatprep.subr.bf16.mxu1 %v974_v57  ;;  %v279_v15 = vld [vmem:[%s1519_s14 + $0x28] sm:$0xff]  ;;  %v280_v16 = vld [vmem:[%s1519_s14 + $0x30] sm:$0xff]  ;;  %v281_v17 = vld [vmem:[%s1519_s14 + $0x38] sm:$0xff] }
  0x7d   : > { %v282_v18 = vld [vmem:[%s1519_s14 + $0x40] sm:$0xff]  ;;  %v283_v19 = vld [vmem:[%s1519_s14 + $0x48] sm:$0xff]  ;;  %v284_v20 = vld [vmem:[%s1519_s14 + $0x50] sm:$0xff] }
  0x7e   : > { %953 = vmatpush1.bf16.msra.mxu0 %v952_v34  ;;  %v285_v21 = vld [vmem:[%s1519_s14 + $0x58] sm:$0xff]  ;;  %v286_v22 = vld [vmem:[%s1519_s14 + $0x60] sm:$0xff]  ;;  %v287_v23 = vld [vmem:[%s1519_s14 + $0x68] sm:$0xff] }
  0x7f   : > { %955 = vmatprep.subr.bf16.mxu0 %v954_v40  ;;  %977 = vmatpush3.bf16.msra.mxu1 %v976_v2  ;;  %v288_v24 = vld [vmem:[%s1519_s14 + $0x70] sm:$0xff]  ;;  %v289_v25 = vld [vmem:[%s1519_s14 + $0x78] sm:$0xff]  ;;  %v551_v26 = vld [vmem:[#allocation7 + $0xc0] sm:$0xff] }
  0x80   : > { %979 = vmatprep.subr.bf16.mxu1 %v978_v5  ;;  %v552_v27 = vld [vmem:[#allocation7 + $0xc8] sm:$0xff]  ;;  %v535_v29 = vld [vmem:[#allocation7 + $0x40] sm:$0xff]  ;;  %v553_v32 = vld [vmem:[#allocation7 + $0xd0] sm:$0xff] }
  0x81   : > { %v982_v28 = vpack.c.bf16 %v552_v27, %v551_v26  ;;  %v536_v30 = vld [vmem:[#allocation7 + $0x48] sm:$0xff]  ;;  %v554_v33 = vld [vmem:[#allocation7 + $0xd8] sm:$0xff]  ;;  %v537_v35 = vld [vmem:[#allocation7 + $0x50] sm:$0xff] }
  0x82   : > { %957 = vmatpush1.bf16.msra.mxu0 %v956_v51  ;;  %v984_v31 = vpack.c.bf16 %v536_v30, %v535_v29  ;;  %v986_v34 = vpack.c.bf16 %v554_v33, %v553_v32  ;;  %v538_v36 = vld [vmem:[#allocation7 + $0x58] sm:$0xff]  ;;  %v555_v38 = vld [vmem:[#allocation7 + $0xe0] sm:$0xff]  ;;  %v540_v41 = vld [vmem:[#allocation7 + $0x68] sm:$0xff]  ;;  %v326_v51 = vsub.s32 0, %v325_v50 }
  0x83   : > { %959 = vmatprep.subr.bf16.mxu0 %v958_v55  ;;  %981 = vmatpush3.bf16.msra.mxu1 %v980_v9  ;;  %v988_v37 = vpack.c.bf16 %v538_v36, %v537_v35  ;;  %v539_v40 = vld [vmem:[#allocation7 + $0x60] sm:$0xff]  ;;  %v557_v43 = vld [vmem:[#allocation7 + $0xf0] sm:$0xff]  ;;  %v558_v44 = vld [vmem:[#allocation7 + $0xf8] sm:$0xff] }
  0x84   : > { %983 = vmatprep.subr.bf16.mxu1 %v982_v28  ;;  %v992_v42 = vpack.c.bf16 %v540_v41, %v539_v40  ;;  %v994_v45 = vpack.c.bf16 %v558_v44, %v557_v43  ;;  %v541_v46 = vld [vmem:[#allocation7 + $0x70] sm:$0xff]  ;;  %v542_v47 = vld [vmem:[#allocation7 + $0x78] sm:$0xff]  ;;  %v322_v52 = vld [vmem:[%s1694_s2] sm:$0x3] }
  0x85   : > { %v996_v48 = vpack.c.bf16 %v542_v47, %v541_v46  ;;  %v1564_v54 = vrot.slane %v322_v52, %v326_v51  ;;  %v1566_v55 = vrot.slane %v322_v52, %v330_v53 }
  0x86   : > { %961 = vmatpush1.bf16.msra.mxu0 %v960_v63 }
  0x87   : > { %963 = vmatprep.subr.bf16.mxu0 %v962_v3  ;;  %985 = vmatpush3.bf16.msra.mxu1 %v984_v31 }
  0x88   : > { %987 = vmatprep.subr.bf16.mxu1 %v986_v34 }
  0x8a   : > { %965 = vmatpush1.bf16.msra.mxu0 %v964_v8 }
  0x8b   : > { %989 = vmatpush3.bf16.msra.mxu1 %v988_v37 }
  0x8d   : > { %399 = vmatmul.mubr.f32.vlgmr.msra.gmra.mrb[0].mxu0 %v274_v10 }
  0x8e   : > { %404 = vmatprep.mubr.f32.mxu0 %v1301_v0 }
  0x91   : > { %405 = vmatmul.mubr.f32.gmra.mrb[2].mxu0 %v275_v11 }
  0x92   : > { %410 = vmatprep.mubr.f32.mxu0 %v1301_v0 }
  0x95   : > { %411 = vmatmul.mubr.f32.gmra.mrb[4].mxu0 %v276_v12 }
  0x96   : > { %416 = vmatprep.mubr.f32.mxu0 %v1301_v0 }
  0x99   : > { %417 = vmatmul.mubr.f32.gmra.mrb[6].mxu0 %v277_v13 }
  0x9a   : > { %422 = vmatprep.mubr.f32.mxu0 %v1301_v0 }
  0x9d   : > { %423 = vmatmul.mubr.f32.gmra.mrb[8].mxu0 %v278_v14 }
  0x9e   : > { %428 = vmatprep.mubr.f32.mxu0 %v1301_v0 }
  0xa1   : > { %429 = vmatmul.mubr.f32.gmra.mrb[10].mxu0 %v279_v15 }
  0xa2   : > { %434 = vmatprep.mubr.f32.mxu0 %v1301_v0 }
  0xa5   : > { %435 = vmatmul.mubr.f32.gmra.mrb[12].mxu0 %v280_v16 }
  0xa6   : > { %440 = vmatprep.mubr.f32.mxu0 %v1301_v0 }
  0xa9   : > { %441 = vmatmul.mubr.f32.gmra.mrb[14].mxu0 %v281_v17 }
  0xaa   : > { %446 = vmatprep.mubr.f32.mxu0 %v1301_v0 }
  0xad   : > { %447 = vmatmul.mubr.f32.gmra.mrb[16].mxu0 %v282_v18 }
  0xae   : > { %452 = vmatprep.mubr.f32.mxu0 %v1301_v0 }
  0xb1   : > { %453 = vmatmul.mubr.f32.gmra.mrb[18].mxu0 %v283_v19 }
  0xb2   : > { %458 = vmatprep.mubr.f32.mxu0 %v1301_v0 }
  0xb5   : > { %459 = vmatmul.mubr.f32.gmra.mrb[20].mxu0 %v284_v20 }
  0xb6   : > { %464 = vmatprep.mubr.f32.mxu0 %v1301_v0 }
  0xb9   : > { %465 = vmatmul.mubr.f32.gmra.mrb[22].mxu0 %v285_v21 }
  0xba   : > { %470 = vmatprep.mubr.f32.mxu0 %v1301_v0 }
  0xbd   : > { %471 = vmatmul.mubr.f32.gmra.mrb[24].mxu0 %v286_v22 }
  0xbe   : > { %476 = vmatprep.mubr.f32.mxu0 %v1301_v0 }
  0xc1   : > { %477 = vmatmul.mubr.f32.gmra.mrb[26].mxu0 %v287_v23 }
  0xc2   : > { %482 = vmatprep.mubr.f32.mxu0 %v1301_v0 }
  0xc5   : > { %483 = vmatmul.mubr.f32.gmra.mrb[28].mxu0 %v288_v24 }
  0xc6   : > { %488 = vmatprep.mubr.f32.mxu0 %v1301_v0  ;;  %v556_v0 = vld [vmem:[#allocation7 + $0xe8] sm:$0xff] }
  0xc7   : > { %v990_v39 = vpack.c.bf16 %v556_v0, %v555_v38 }
  0xc9   : > { %489 = vmatmul.mubr.f32.gmra.mrb[30].mxu0 %v289_v25  ;;  %991 = vmatprep.subr.bf16.mxu1 %v990_v39 }
  0xca   : > { %993 = vmatpush3.bf16.msra.mxu1 %v992_v42 }
  0xcb   : > { %995 = vmatprep.subr.bf16.mxu1 %v994_v45 }
  0xce   : > { %997 = vmatpush3.bf16.msra.mxu1 %v996_v48 }
 0x160   : > { %v400_v56 = vpop.f32.mrb[0].mxu0 }
 0x161   : > { %v401_v57 = vadd.f32 %v400_v56, %v1564_v54  ;;  %v402_v58 = vpop.f32.mrb[1].mxu0 }
 0x162   : > { %v403_v59 = vadd.f32 %v402_v58, %v1566_v55 }
 0x164   : > { %1072 = vtanh.f32 %v403_v59  ;;  %v406_v60 = vpop.f32.mrb[2].mxu0 }
 0x165   : > { %1074 = vtanh.f32 %v401_v57  ;;  %v407_v61 = vadd.f32 %v406_v60, %v1564_v54  ;;  %v408_v62 = vpop.f32.mrb[3].mxu0 }
 0x166   : > { %v409_v63 = vadd.f32 %v408_v62, %v1566_v55 }
 0x168   : > { %1076 = vtanh.f32 %v409_v63  ;;  %v412_v1 = vpop.f32.mrb[4].mxu0 }
 0x169   : > { %1078 = vtanh.f32 %v407_v61  ;;  %v413_v2 = vadd.f32 %v412_v1, %v1564_v54  ;;  %v414_v3 = vpop.f32.mrb[5].mxu0 }
 0x16a   : > { %v415_v4 = vadd.f32 %v414_v3, %v1566_v55 }
 0x16c   : > { %1080 = vtanh.f32 %v415_v4  ;;  %v418_v5 = vpop.f32.mrb[6].mxu0 }
 0x16d   : > { %1082 = vtanh.f32 %v413_v2  ;;  %v419_v6 = vadd.f32 %v418_v5, %v1564_v54  ;;  %v420_v7 = vpop.f32.mrb[7].mxu0 }
 0x16e   : > { %v1073_v8 = vpop.eup %1072  ;;  %v421_v9 = vadd.f32 %v420_v7, %v1566_v55 }
 0x16f   : > { %v1075_v10 = vpop.eup %1074  ;;  %630 = vmatprep.mubr.f32.mxu1 %v1073_v8 }
 0x170   : > { %1084 = vtanh.f32 %v421_v9  ;;  %v424_v11 = vpop.f32.mrb[8].mxu0  ;;  %631 = vmatmul.mubr.f32.vlgmr.msra.gmra.mrb[0].mxu1 %v1075_v10 }
 0x171   : > { %1086 = vtanh.f32 %v419_v6  ;;  %v425_v12 = vadd.f32 %v424_v11, %v1564_v54  ;;  %v426_v13 = vpop.f32.mrb[9].mxu0 }
 0x172   : > { %v1077_v14 = vpop.eup %1076  ;;  %v427_v15 = vadd.f32 %v426_v13, %v1566_v55 }
 0x173   : > { %v1079_v16 = vpop.eup %1078  ;;  %635 = vmatprep.mubr.f32.mxu1 %v1077_v14 }
 0x174   : > { %1088 = vtanh.f32 %v427_v15  ;;  %v430_v17 = vpop.f32.mrb[10].mxu0  ;;  %636 = vmatmul.mubr.f32.gmra.mrb[2].mxu1 %v1079_v16 }
 0x175   : > { %1090 = vtanh.f32 %v425_v12  ;;  %v431_v18 = vadd.f32 %v430_v17, %v1564_v54  ;;  %v432_v19 = vpop.f32.mrb[11].mxu0 }
 0x176   : > { %v1081_v20 = vpop.eup %1080  ;;  %v433_v21 = vadd.f32 %v432_v19, %v1566_v55 }
 0x177   : > { %v1083_v22 = vpop.eup %1082  ;;  %640 = vmatprep.mubr.f32.mxu1 %v1081_v20 }
 0x178   : > { %1092 = vtanh.f32 %v433_v21  ;;  %v436_v23 = vpop.f32.mrb[12].mxu0  ;;  %641 = vmatmul.mubr.f32.gmra.mrb[4].mxu1 %v1083_v22 }
 0x179   : > { %1094 = vtanh.f32 %v431_v18  ;;  %v437_v24 = vadd.f32 %v436_v23, %v1564_v54  ;;  %v438_v25 = vpop.f32.mrb[13].mxu0 }
 0x17a   : > { %v1085_v26 = vpop.eup %1084  ;;  %v439_v27 = vadd.f32 %v438_v25, %v1566_v55 }
 0x17b   : > { %v1087_v28 = vpop.eup %1086  ;;  %645 = vmatprep.mubr.f32.mxu1 %v1085_v26 }
 0x17c   : > { %1096 = vtanh.f32 %v439_v27  ;;  %v442_v29 = vpop.f32.mrb[14].mxu0  ;;  %646 = vmatmul.mubr.f32.gmra.mrb[6].mxu1 %v1087_v28 }
 0x17d   : > { %1098 = vtanh.f32 %v437_v24  ;;  %v443_v30 = vadd.f32 %v442_v29, %v1564_v54  ;;  %v444_v31 = vpop.f32.mrb[15].mxu0 }
 0x17e   : > { %v1089_v32 = vpop.eup %1088  ;;  %v445_v33 = vadd.f32 %v444_v31, %v1566_v55 }
 0x17f   : > { %v1091_v34 = vpop.eup %1090  ;;  %650 = vmatprep.mubr.f32.mxu1 %v1089_v32 }
 0x180   : > { %1100 = vtanh.f32 %v445_v33  ;;  %v448_v35 = vpop.f32.mrb[16].mxu0  ;;  %651 = vmatmul.mubr.f32.gmra.mrb[8].mxu1 %v1091_v34 }
 0x181   : > { %1102 = vtanh.f32 %v443_v30  ;;  %v449_v36 = vadd.f32 %v448_v35, %v1564_v54  ;;  %v450_v37 = vpop.f32.mrb[17].mxu0 }
 0x182   : > { %v1093_v38 = vpop.eup %1092  ;;  %v451_v0 = vadd.f32 %v450_v37, %v1566_v55 }
 0x183   : > { %v1095_v39 = vpop.eup %1094  ;;  %655 = vmatprep.mubr.f32.mxu1 %v1093_v38 }
 0x184   : > { %1104 = vtanh.f32 %v451_v0  ;;  %v454_v40 = vpop.f32.mrb[18].mxu0  ;;  %656 = vmatmul.mubr.f32.gmra.mrb[10].mxu1 %v1095_v39 }
 0x185   : > { %1106 = vtanh.f32 %v449_v36  ;;  %v455_v41 = vadd.f32 %v454_v40, %v1564_v54  ;;  %v456_v42 = vpop.f32.mrb[19].mxu0 }
 0x186   : > { %v1097_v43 = vpop.eup %1096  ;;  %v457_v44 = vadd.f32 %v456_v42, %v1566_v55 }
 0x187   : > { %v1099_v45 = vpop.eup %1098  ;;  %660 = vmatprep.mubr.f32.mxu1 %v1097_v43 }
 0x188   : > { %1108 = vtanh.f32 %v457_v44  ;;  %v460_v46 = vpop.f32.mrb[20].mxu0  ;;  %661 = vmatmul.mubr.f32.gmra.mrb[12].mxu1 %v1099_v45 }
 0x189   : > { %1110 = vtanh.f32 %v455_v41  ;;  %v461_v47 = vadd.f32 %v460_v46, %v1564_v54  ;;  %v462_v48 = vpop.f32.mrb[21].mxu0 }
 0x18a   : > { %v1101_v49 = vpop.eup %1100  ;;  %v463_v50 = vadd.f32 %v462_v48, %v1566_v55 }
 0x18b   : > { %v1103_v51 = vpop.eup %1102  ;;  %665 = vmatprep.mubr.f32.mxu1 %v1101_v49 }
 0x18c   : > { %1112 = vtanh.f32 %v463_v50  ;;  %v466_v52 = vpop.f32.mrb[22].mxu0  ;;  %666 = vmatmul.mubr.f32.gmra.mrb[14].mxu1 %v1103_v51 }
 0x18d   : > { %1114 = vtanh.f32 %v461_v47  ;;  %v467_v53 = vadd.f32 %v466_v52, %v1564_v54  ;;  %v468_v56 = vpop.f32.mrb[23].mxu0 }
 0x18e   : > { %v1105_v57 = vpop.eup %1104  ;;  %v469_v58 = vadd.f32 %v468_v56, %v1566_v55 }
 0x18f   : > { %v1107_v59 = vpop.eup %1106  ;;  %670 = vmatprep.mubr.f32.mxu1 %v1105_v57 }
 0x190   : > { %1116 = vtanh.f32 %v469_v58  ;;  %v472_v60 = vpop.f32.mrb[24].mxu0  ;;  %671 = vmatmul.mubr.f32.gmra.mrb[16].mxu1 %v1107_v59 }
 0x191   : > { %1118 = vtanh.f32 %v467_v53  ;;  %v473_v61 = vadd.f32 %v472_v60, %v1564_v54  ;;  %v474_v62 = vpop.f32.mrb[25].mxu0 }
 0x192   : > { %v1109_v63 = vpop.eup %1108  ;;  %v475_v1 = vadd.f32 %v474_v62, %v1566_v55 }
 0x193   : > { %v1111_v2 = vpop.eup %1110  ;;  %675 = vmatprep.mubr.f32.mxu1 %v1109_v63 }
 0x194   : > { %1120 = vtanh.f32 %v475_v1  ;;  %v478_v3 = vpop.f32.mrb[26].mxu0  ;;  %676 = vmatmul.mubr.f32.gmra.mrb[18].mxu1 %v1111_v2 }
 0x195   : > { %1122 = vtanh.f32 %v473_v61  ;;  %v479_v4 = vadd.f32 %v478_v3, %v1564_v54  ;;  %v480_v5 = vpop.f32.mrb[27].mxu0 }
 0x196   : > { %v1113_v6 = vpop.eup %1112  ;;  %v481_v7 = vadd.f32 %v480_v5, %v1566_v55 }
 0x197   : > { %v1115_v8 = vpop.eup %1114  ;;  %680 = vmatprep.mubr.f32.mxu1 %v1113_v6 }
 0x198   : > { %1124 = vtanh.f32 %v481_v7  ;;  %v484_v9 = vpop.f32.mrb[28].mxu0  ;;  %681 = vmatmul.mubr.f32.gmra.mrb[20].mxu1 %v1115_v8 }
 0x199   : > { %1126 = vtanh.f32 %v479_v4  ;;  %v485_v10 = vadd.f32 %v484_v9, %v1564_v54  ;;  %v486_v11 = vpop.f32.mrb[29].mxu0 }
 0x19a   : > { %v1117_v12 = vpop.eup %1116  ;;  %v487_v13 = vadd.f32 %v486_v11, %v1566_v55 }
 0x19b   : > { %v1119_v14 = vpop.eup %1118  ;;  %685 = vmatprep.mubr.f32.mxu1 %v1117_v12 }
 0x19c   : > { %1128 = vtanh.f32 %v487_v13  ;;  %v490_v15 = vpop.f32.mrb[30].mxu0  ;;  %686 = vmatmul.mubr.f32.gmra.mrb[22].mxu1 %v1119_v14 }
 0x19d   : > { %1130 = vtanh.f32 %v485_v10  ;;  %v491_v16 = vadd.f32 %v490_v15, %v1564_v54  ;;  %v492_v17 = vpop.f32.mrb[31].mxu0 }
 0x19e   : > { %v1121_v18 = vpop.eup %1120  ;;  %v493_v19 = vadd.f32 %v492_v17, %v1566_v55  ;;  %v1603_v55 = vld [vmem:[%s1696_s4] ss:$0 sm:$0xff] }
 0x19f   : > { %v1123_v20 = vpop.eup %1122  ;;  %690 = vmatprep.mubr.f32.mxu1 %v1121_v18 }
 0x1a0   : > { %1132 = vtanh.f32 %v493_v19  ;;  %691 = vmatmul.mubr.f32.gmra.mrb[24].mxu1 %v1123_v20 }
 0x1a1   : > { %1134 = vtanh.f32 %v491_v16 }
 0x1a2   : > { %v1125_v21 = vpop.eup %1124 }
 0x1a3   : > { %v1127_v22 = vpop.eup %1126  ;;  %695 = vmatprep.mubr.f32.mxu1 %v1125_v21 }
 0x1a4   : > { %696 = vmatmul.mubr.f32.gmra.mrb[26].mxu1 %v1127_v22 }
 0x1a6   : > { %v1129_v23 = vpop.eup %1128 }
 0x1a7   : > { %v1131_v24 = vpop.eup %1130  ;;  %700 = vmatprep.mubr.f32.mxu1 %v1129_v23 }
 0x1a8   : > { %701 = vmatmul.mubr.f32.gmra.mrb[28].mxu1 %v1131_v24 }
 0x1aa   : > { %v1133_v25 = vpop.eup %1132 }
 0x1ab   : > { %v1135_v54 = vpop.eup %1134  ;;  %705 = vmatprep.mubr.f32.mxu1 %v1133_v25 }
 0x1ac   : > { %706 = vmatmul.mubr.f32.gmra.mrb[30].mxu1 %v1135_v54 }
 0x243   : > { %v886_v26 = vpop.f32.mrb[0].mxu1 }
 0x244   : > { %v887_v27 = vpop.f32.mrb[1].mxu1 }
 0x245   : > { %v888_v28 = vadd.f32 %v887_v27, %v886_v26 }
 0x247   : > { %v633_v29 = vadd.f32 %v888_v28, %v1603_v55  ;;  %v889_v30 = vpop.f32.mrb[2].mxu1 }
 0x248   : > { %v890_v31 = vpop.f32.mrb[3].mxu1 }
 0x249   : > { %711 = vst [vmem:[%s1608_s10] sm:$0xff] %v633_v29  ;;  %v891_v32 = vadd.f32 %v890_v31, %v889_v30 }
 0x24b   : > { %v638_v33 = vadd.f32 %v891_v32, %v1603_v55  ;;  %v892_v34 = vpop.f32.mrb[4].mxu1 }
 0x24c   : > { %v893_v35 = vpop.f32.mrb[5].mxu1 }
 0x24d   : > { %712 = vst [vmem:[%s1608_s10 + $0x8] sm:$0xff] %v638_v33  ;;  %v894_v36 = vadd.f32 %v893_v35, %v892_v34 }
 0x24f   : > { %v643_v37 = vadd.f32 %v894_v36, %v1603_v55  ;;  %v895_v38 = vpop.f32.mrb[6].mxu1 }
 0x250   : > { %v896_v0 = vpop.f32.mrb[7].mxu1 }
 0x251   : > { %713 = vst [vmem:[%s1608_s10 + $0x10] sm:$0xff] %v643_v37  ;;  %v897_v39 = vadd.f32 %v896_v0, %v895_v38 }
 0x253   : > { %v648_v40 = vadd.f32 %v897_v39, %v1603_v55  ;;  %v898_v41 = vpop.f32.mrb[8].mxu1 }
 0x254   : > { %v899_v42 = vpop.f32.mrb[9].mxu1 }
 0x255   : > { %714 = vst [vmem:[%s1608_s10 + $0x18] sm:$0xff] %v648_v40  ;;  %v900_v43 = vadd.f32 %v899_v42, %v898_v41 }
 0x257   : > { %v653_v44 = vadd.f32 %v900_v43, %v1603_v55  ;;  %v901_v45 = vpop.f32.mrb[10].mxu1 }
 0x258   : > { %v902_v46 = vpop.f32.mrb[11].mxu1 }
 0x259   : > { %715 = vst [vmem:[%s1608_s10 + $0x20] sm:$0xff] %v653_v44  ;;  %v903_v47 = vadd.f32 %v902_v46, %v901_v45 }
 0x25b   : > { %v658_v48 = vadd.f32 %v903_v47, %v1603_v55  ;;  %v904_v49 = vpop.f32.mrb[12].mxu1 }
 0x25c   : > { %v905_v50 = vpop.f32.mrb[13].mxu1 }
 0x25d   : > { %716 = vst [vmem:[%s1608_s10 + $0x28] sm:$0xff] %v658_v48  ;;  %v906_v51 = vadd.f32 %v905_v50, %v904_v49 }
 0x25f   : > { %v663_v52 = vadd.f32 %v906_v51, %v1603_v55  ;;  %v907_v53 = vpop.f32.mrb[14].mxu1 }
 0x260   : > { %v908_v56 = vpop.f32.mrb[15].mxu1 }
 0x261   : > { %717 = vst [vmem:[%s1608_s10 + $0x30] sm:$0xff] %v663_v52  ;;  %v909_v57 = vadd.f32 %v908_v56, %v907_v53 }
 0x263   : > { %v668_v58 = vadd.f32 %v909_v57, %v1603_v55  ;;  %v910_v59 = vpop.f32.mrb[16].mxu1 }
 0x264   : > { %v911_v60 = vpop.f32.mrb[17].mxu1 }
 0x265   : > { %718 = vst [vmem:[%s1608_s10 + $0x38] sm:$0xff] %v668_v58  ;;  %v912_v61 = vadd.f32 %v911_v60, %v910_v59 }
 0x267   : > { %v673_v62 = vadd.f32 %v912_v61, %v1603_v55  ;;  %v913_v63 = vpop.f32.mrb[18].mxu1 }
 0x268   : > { %v914_v1 = vpop.f32.mrb[19].mxu1 }
 0x269   : > { %719 = vst [vmem:[%s1608_s10 + $0x40] sm:$0xff] %v673_v62  ;;  %v915_v2 = vadd.f32 %v914_v1, %v913_v63 }
 0x26b   : > { %v678_v3 = vadd.f32 %v915_v2, %v1603_v55  ;;  %v916_v4 = vpop.f32.mrb[20].mxu1 }
 0x26c   : > { %v917_v5 = vpop.f32.mrb[21].mxu1 }
 0x26d   : > { %720 = vst [vmem:[%s1608_s10 + $0x48] sm:$0xff] %v678_v3  ;;  %v918_v6 = vadd.f32 %v917_v5, %v916_v4 }
 0x26f   : > { %v683_v7 = vadd.f32 %v918_v6, %v1603_v55  ;;  %v919_v8 = vpop.f32.mrb[22].mxu1 }
 0x270   : > { %v920_v9 = vpop.f32.mrb[23].mxu1 }
 0x271   : > { %721 = vst [vmem:[%s1608_s10 + $0x50] sm:$0xff] %v683_v7  ;;  %v921_v10 = vadd.f32 %v920_v9, %v919_v8 }
 0x273   : > { %v688_v11 = vadd.f32 %v921_v10, %v1603_v55  ;;  %v922_v12 = vpop.f32.mrb[24].mxu1 }
 0x274   : > { %v923_v13 = vpop.f32.mrb[25].mxu1 }
 0x275   : > { %722 = vst [vmem:[%s1608_s10 + $0x58] sm:$0xff] %v688_v11  ;;  %v924_v14 = vadd.f32 %v923_v13, %v922_v12 }
 0x277   : > { %v693_v15 = vadd.f32 %v924_v14, %v1603_v55  ;;  %v925_v16 = vpop.f32.mrb[26].mxu1 }
 0x278   : > { %v926_v17 = vpop.f32.mrb[27].mxu1 }
 0x279   : > { %723 = vst [vmem:[%s1608_s10 + $0x60] sm:$0xff] %v693_v15  ;;  %v927_v18 = vadd.f32 %v926_v17, %v925_v16 }
 0x27b   : > { %v698_v19 = vadd.f32 %v927_v18, %v1603_v55  ;;  %v928_v20 = vpop.f32.mrb[28].mxu1 }
 0x27c   : > { %v929_v21 = vpop.f32.mrb[29].mxu1 }
 0x27d   : > { %724 = vst [vmem:[%s1608_s10 + $0x68] sm:$0xff] %v698_v19  ;;  %v930_v22 = vadd.f32 %v929_v21, %v928_v20 }
 0x27f   : > { %v703_v23 = vadd.f32 %v930_v22, %v1603_v55  ;;  %v931_v24 = vpop.f32.mrb[30].mxu1 }
 0x280   : > { %v932_v25 = vpop.f32.mrb[31].mxu1 }
 0x281   : > { %725 = vst [vmem:[%s1608_s10 + $0x70] sm:$0xff] %v703_v23  ;;  %v933_v54 = vadd.f32 %v932_v25, %v931_v24 }
 0x283   : > { %v708_v26 = vadd.f32 %v933_v54, %v1603_v55 }
 0x285   : > { %726 = vst [vmem:[%s1608_s10 + $0x78] sm:$0xff] %v708_v26 }
 0x286   : > { %1235 = shalt.err (!%p1232_p2)
}
 0x287   : > { %s1236_s14 = scalar_lea.hbm %s1644_s11, 2048  ;;  %s1240_s12 = scalar_lea.hbm %s1697_s5, 4096 }
 0x288   : > { %p1237_p13 = scmp.ne.s32.totalorder %s1644_s11, %s1236_s14  ;;  %p1241_p4 = scmp.lt.u32.totalorder %s1644_s11, %s1697_s5 }
 0x289   : > { %p1242_p7 = scmp.lt.u32.totalorder %s1240_s12, %s1236_s14  ;;  %p1244_p11 = scmp.lt.u32.totalorder %s1236_s14, %s1644_s11 }
 0x28a   : > { %p1238_p6 = pnand %p1237_p13, %p1711_p0 }
 0x28b   : > { %p1243_p8 = por %p1242_p7, %p1241_p4 }
 0x28c   : > { %p1239_p10 = pneg %p1238_p6 }
 0x28d   : > { %p1245_p1 = por %p1244_p11, %p1243_p8 }
 0x28f   : > { %p1246_p3 = pnand %p1245_p1, %p1239_p10 }
 0x291   : > { %1249 = shalt.err (!%p1246_p3)
}
 0x292   : > { %s1303_s28 = smov 128   ;;  %s1304_s9 = smov 8  }
 0x293   : > { %1008 = dma.vmem_to_hbm [thread:$0]  (%p1711_p0), %s1646_s15, 2048, %s1644_s11, %s728_s23, %s1303_s28, %s1303_s28, %s1304_s9  }
 0x294 PF: > { %s756_s30 = sand.u32 1, %s1280_s18   ;;  %p1712_p5 = scmp.ne.s32.totalorder %s1702_s25, 0 }
 0x295   : > { %p1713_p9 = scmp.ge.s32.totalorder %s1292_s21, 2  ;;  %s757_s7 = scalar_lea.sflag [#allocation4], %s756_s30 }
 0x297   : > { %p1022_p12 = pnand %p1713_p9, %p1712_p5 }
 0x299   : > { %1275 = dma.done.wait (!%p1022_p12), %s757_s7, 2048  }
 0x29a   : > { %1277 = vsyncadd (!%p1022_p12), %s757_s7, 4294965248  ;;  %p19_p2 = scmp.ge.s32.totalorder %s1448_s16, 4   ;;  %s1714_s18 = smov %s1284_s19 }
 0x29b   : > { %s1715_s19 = smov %s1288_s20  ;;  %s1716_s20 = smov %s1457_s27 }
 0x29c   : > { %s1717_s21 = smov %s1448_s16  ;;  %21 = sbr.rel (!%p19_p2) target bundleno = 6 (0x6), region = 93 }
 0x2a3   :  { %762 = vsyncpa [#allocation3], 1 }
 0x2a4   :  { %764 = vsyncpa [#allocation3 + $0x1], 1 }
 0x2a5   :  { %765 = vsyncpa [#allocation6], 1 }
 0x2a6   :  { %766 = vsyncpa [#allocation4], 1 }
 0x2a7   :  { %768 = vsyncpa [#allocation4 + $0x1], 1 }

</bundles_post_ra>
